<compile_context>
chip_gen: v6e
topology: v6e:2x2x1
jax: 0.10.0
libtpu: 0.0.40
codegen_flags: <defaults>
</compile_context>

<pallas_src>
import jax
import jax.numpy as jnp
from jax.experimental import pallas as pl
from jax.experimental.pallas import tpu as pltpu

BN_EPS = 1e-5
H = 64


def _mlp_kernel(xT_ref, w1t_ref, b1_ref, w2t_ref, b2_ref, w3c_ref, b3_ref,
                o_ref):
    # layer_1 + ReLU.  (H, nb) @ (nb, bt) -> (H, bt), f32 accumulation.
    h = jnp.dot(w1t_ref[...], xT_ref[...],
                preferred_element_type=jnp.float32) + b1_ref[...]
    h = jnp.maximum(h, 0.0)                                   # (H, bt) f32

    # batchnorm1 folded into layer_2 params.
    # layer_2 + ReLU.  Cast the activation to the weights' dtype so the bf16
    # path feeds bf16 x bf16 operands to the MXU (f32 accumulate).
    h = jnp.dot(w2t_ref[...], h.astype(w2t_ref.dtype),
                preferred_element_type=jnp.float32) + b2_ref[...]
    h = jnp.maximum(h, 0.0)                                   # (H, bt) f32

    # batchnorm2 folded into layer_out params; dropout (eval) -> identity.
    # layer_out on the VPU + cross-sublane reduce (avoids an M=1 MXU matmul).
    logits = jnp.sum(h * w3c_ref[...], axis=0, keepdims=True) + b3_ref[...]
    o_ref[...] = jax.nn.sigmoid(logits)                       # (1, bt)


def _fold_batchnorms(params):
    """Fold eval-mode BatchNorms into the following Linear layers."""
    s1 = params["g1"] * jax.lax.rsqrt(params["v1"] + BN_EPS)          # (1, H)
    t1 = params["be1"] - params["m1"] * s1                            # (1, H)
    s2 = params["g2"] * jax.lax.rsqrt(params["v2"] + BN_EPS)
    t2 = params["be2"] - params["m2"] * s2

    w1, b1 = params["w1"], params["b1"]
    w2 = s1.reshape(-1, 1) * params["w2"]                             # diag(s1) @ W2
    b2 = params["b2"] + t1 @ params["w2"]
    w3 = s2.reshape(-1, 1) * params["w3"]                             # diag(s2) @ W3
    b3 = params["b3"] + t2 @ params["w3"]
    return w1, b1, w2, b2, w3, b3


def binary_classification_forward(x, params, *, batch_tile=4096,
                                  compute_dtype=jnp.bfloat16):
    """x: (B, nb_nodes) float32. Returns (B, 1) float32 sigmoid probabilities."""
    B, nb_nodes = x.shape
    w1, b1, w2, b2, w3, b3 = _fold_batchnorms(params)

    # Batch-on-lanes parameter layout. MXU operands in compute_dtype; biases,
    # the final (H,1) column and all elementwise math stay f32.
    w1t = w1.T.astype(compute_dtype)                # (H, nb_nodes)
    w2t = w2.T.astype(compute_dtype)                # (H, H)
    b1c = b1.reshape(H, 1).astype(jnp.float32)      # (H, 1)
    b2c = b2.reshape(H, 1).astype(jnp.float32)      # (H, 1)
    w3c = w3.reshape(H, 1).astype(jnp.float32)      # (H, 1)
    b3s = b3.reshape(1, 1).astype(jnp.float32)      # (1, 1)

    # Lane-dense batch tiling (always multiples of 128). When the whole batch
    # fits in one tile, still split into >= 2 grid steps so both v7x
    # TensorCores get work. Going beyond bt=8192 on v7x (64 MiB VMEM) would
    # warrant an explicit vmem_limit_bytes; 4096 fits all generations' defaults.
    assert batch_tile % 128 == 0, "batch_tile must be a multiple of 128"
    B128 = pl.cdiv(B, 128) * 128
    if B128 <= 128:
        bt = 128
    elif B128 <= batch_tile:
        bt = pl.cdiv(B128 // 2, 128) * 128
    else:
        bt = batch_tile
    B_pad = pl.cdiv(B, bt) * bt

    # Transpose x once in the wrapper (after the dtype cast so the transpose
    # moves half the bytes in bf16). A caller holding x pre-transposed as
    # (nb_nodes, B) could skip this pass entirely.
    xT = x.astype(compute_dtype).T                   # (nb_nodes, B)
    if B_pad != B:
        xT = jnp.pad(xT, ((0, 0), (0, B_pad - B)))

    def rep_spec(arr):
        return pl.BlockSpec(arr.shape, lambda i: (0,) * arr.ndim)

    in_specs = [
        pl.BlockSpec((nb_nodes, bt), lambda i: (0, i)),   # xT, tiled on lanes
        rep_spec(w1t), rep_spec(b1c),
        rep_spec(w2t), rep_spec(b2c),
        rep_spec(w3c), rep_spec(b3s),
    ]
    out_spec = pl.BlockSpec((1, bt), lambda i: (0, i))    # lane-dense output

    itemsize = jnp.dtype(compute_dtype).itemsize
    flops = 2 * B_pad * (nb_nodes * H + H * H + H)
    bytes_accessed = (B_pad * nb_nodes * itemsize
                      + (w1t.size + w2t.size) * itemsize
                      + (b1c.size + b2c.size + w3c.size + b3s.size) * 4
                      + B_pad * 4)
    cost = pl.CostEstimate(flops=flops, transcendentals=B_pad,
                           bytes_accessed=bytes_accessed)

    fn = pl.pallas_call(
        _mlp_kernel,
        out_shape=jax.ShapeDtypeStruct((1, B_pad), jnp.float32),
        grid_spec=pltpu.PrefetchScalarGridSpec(
            num_scalar_prefetch=0,
            grid=(B_pad // bt,),
            in_specs=in_specs,
            out_specs=out_spec,
        ),
        compiler_params=pltpu.CompilerParams(
            dimension_semantics=("parallel",),
        ),
        cost_estimate=cost,
    )
    out_row = fn(xT, w1t, b1c, w2t, b2c, w3c, b3s)    # (1, B_pad)
    return out_row[0, :B].reshape(B, 1)


def init_params(nb_nodes, key):
    """Deterministic synthetic parameters matching the PyTorch module shapes.

    PyTorch nn.Linear(in, out) stores weight (out, in); we keep the transpose
    (in, out) here. BatchNorm state is made non-trivial so the wrapper-side
    BN folding is actually exercised.
    """
    ks = jax.random.split(key, 14)

    def lin(kw, kb, fan_in, fan_out):
        bound = 1.0 / jnp.sqrt(fan_in)
        w = jax.random.uniform(kw, (fan_in, fan_out), jnp.float32, -bound, bound)
        b = jax.random.uniform(kb, (1, fan_out), jnp.float32, -bound, bound)
        return w, b

    w1, b1 = lin(ks[0], ks[1], nb_nodes, H)
    w2, b2 = lin(ks[2], ks[3], H, H)
    w3, b3 = lin(ks[4], ks[5], H, 1)

    def bn(kg, kb, km, kv):
        g = 1.0 + 0.1 * jax.random.normal(kg, (1, H), jnp.float32)
        be = 0.1 * jax.random.normal(kb, (1, H), jnp.float32)
        m = 0.1 * jax.random.normal(km, (1, H), jnp.float32)
        v = 1.0 + 0.2 * jax.random.uniform(kv, (1, H), jnp.float32)
        return g, be, m, v

    g1, be1, m1, v1 = bn(ks[6], ks[7], ks[8], ks[9])
    g2, be2, m2, v2 = bn(ks[10], ks[11], ks[12], ks[13])

    return dict(
        w1=w1, b1=b1, g1=g1, be1=be1, m1=m1, v1=v1,
        w2=w2, b2=b2, g2=g2, be2=be2, m2=m2, v2=v2,
        w3=w3, b3=b3,
    )


def reference_forward(x, p):
    """Plain-JAX reference with the BatchNorms left unfused."""
    h = jnp.maximum(x @ p["w1"] + p["b1"], 0.0)
    h = (h - p["m1"]) * jax.lax.rsqrt(p["v1"] + BN_EPS) * p["g1"] + p["be1"]
    h = jnp.maximum(h @ p["w2"] + p["b2"], 0.0)
    h = (h - p["m2"]) * jax.lax.rsqrt(p["v2"] + BN_EPS) * p["g2"] + p["be2"]
    return jax.nn.sigmoid(h @ p["w3"] + p["b3"])


if __name__ == "__main__":
    key = jax.random.PRNGKey(0)
    k_x, k_p, k_x2 = jax.random.split(key, 3)

    NB_NODES = 32
    params = init_params(NB_NODES, k_p)

    # 1) Small batch, f32 path (single 128-padded tile).
    B_small = 16
    x_small = jax.random.normal(k_x, (B_small, NB_NODES), jnp.float32)
    out_small = jax.block_until_ready(
        binary_classification_forward(x_small, params,
                                      compute_dtype=jnp.float32))
    ref_small = reference_forward(x_small, params)
    assert out_small.shape == (B_small, 1)
    assert jnp.allclose(out_small, ref_small, atol=2e-5, rtol=1e-4), \
        "small-batch mismatch vs JAX reference"

    # 2) Non-multiple batch, f32 path: >= 2 parallel grid steps + padding.
    B_big = 1000
    x_big = jax.random.normal(k_x2, (B_big, NB_NODES), jnp.float32)
    out_big = jax.block_until_ready(
        binary_classification_forward(x_big, params,
                                      compute_dtype=jnp.float32))
    ref_big = reference_forward(x_big, params)
    assert out_big.shape == (B_big, 1)
    assert jnp.allclose(out_big, ref_big, atol=2e-5, rtol=1e-4), \
        "tiled-batch mismatch vs JAX reference"

    # 3) Default bf16 streaming path (bf16 MXU operands, f32 accumulation).
    out_bf16 = jax.block_until_ready(
        binary_classification_forward(x_big, params))
    assert out_bf16.shape == (B_big, 1)
    assert jnp.allclose(out_bf16, ref_big, atol=3e-2, rtol=3e-2), \
        "bf16 path mismatch vs JAX reference"

    print("KERNEL_OK")
</pallas_src>

<mosaic_0001>
module attributes {stable_mosaic.version = 11 : i64} {
  func.func @_mlp_kernel(%arg0: i32, %arg1: memref<32x128xf32, #tpu.memory_space<vmem>>, %arg2: memref<64x32xf32, #tpu.memory_space<vmem>>, %arg3: memref<64x1xf32, #tpu.memory_space<vmem>>, %arg4: memref<64x64xf32, #tpu.memory_space<vmem>>, %arg5: memref<64x1xf32, #tpu.memory_space<vmem>>, %arg6: memref<64x1xf32, #tpu.memory_space<vmem>>, %arg7: memref<1x1xf32, #tpu.memory_space<vmem>>, %arg8: memref<1x128xf32, #tpu.memory_space<vmem>>) attributes {dimension_semantics = [#tpu.dimension_semantics<parallel>], iteration_bounds = array<i64: 1>, scalar_prefetch = 0 : i64, scratch_operands = 0 : i64, tpu.core_type = #tpu.core_type<tc>, window_params = [{transform_indices = @transform_0, window_bounds = array<i64: 32, 128>}, {pipeline_mode = #tpu.pipeline_mode<synchronous>, transform_indices = @transform_1, window_bounds = array<i64: 64, 32>}, {pipeline_mode = #tpu.pipeline_mode<synchronous>, transform_indices = @transform_2, window_bounds = array<i64: 64, 1>}, {pipeline_mode = #tpu.pipeline_mode<synchronous>, transform_indices = @transform_3, window_bounds = array<i64: 64, 64>}, {pipeline_mode = #tpu.pipeline_mode<synchronous>, transform_indices = @transform_4, window_bounds = array<i64: 64, 1>}, {pipeline_mode = #tpu.pipeline_mode<synchronous>, transform_indices = @transform_5, window_bounds = array<i64: 64, 1>}, {pipeline_mode = #tpu.pipeline_mode<synchronous>, transform_indices = @transform_6, window_bounds = array<i64: 1, 1>}, {transform_indices = @transform_7, window_bounds = array<i64: 1, 128>}]} {
    %c0 = arith.constant 0 : index
    %c0_0 = arith.constant 0 : index
    %0 = vector.load %arg2[%c0, %c0_0] : memref<64x32xf32, #tpu.memory_space<vmem>>, vector<64x32xf32>
    %c0_1 = arith.constant 0 : index
    %c0_2 = arith.constant 0 : index
    %1 = vector.load %arg1[%c0_1, %c0_2] : memref<32x128xf32, #tpu.memory_space<vmem>>, vector<32x128xf32>
    %cst = arith.constant dense<0.000000e+00> : vector<64x128xf32>
    %2 = tpu.matmul %0, %1, %cst {dimension_numbers = #tpu.dot_dimension_numbers<[1], [0], [0], [1], [0, 0, 1, 1], [], []>} : vector<64x32xf32>, vector<32x128xf32>, vector<64x128xf32> -> vector<64x128xf32>
    %c0_3 = arith.constant 0 : index
    %c0_4 = arith.constant 0 : index
    %3 = vector.load %arg3[%c0_3, %c0_4] : memref<64x1xf32, #tpu.memory_space<vmem>>, vector<64x1xf32>
    %4 = vector.broadcast %3 : vector<64x1xf32> to vector<64x128xf32>
    %5 = arith.addf %2, %4 : vector<64x128xf32>
    %cst_5 = arith.constant 0.000000e+00 : f32
    %6 = vector.broadcast %cst_5 : f32 to vector<64x128xf32>
    %7 = arith.maximumf %5, %6 : vector<64x128xf32>
    %c0_6 = arith.constant 0 : index
    %c0_7 = arith.constant 0 : index
    %8 = vector.load %arg4[%c0_6, %c0_7] : memref<64x64xf32, #tpu.memory_space<vmem>>, vector<64x64xf32>
    %cst_8 = arith.constant dense<0.000000e+00> : vector<64x128xf32>
    %9 = tpu.matmul %8, %7, %cst_8 {dimension_numbers = #tpu.dot_dimension_numbers<[1], [0], [0], [1], [0, 0, 1, 1], [], []>} : vector<64x64xf32>, vector<64x128xf32>, vector<64x128xf32> -> vector<64x128xf32>
    %c0_9 = arith.constant 0 : index
    %c0_10 = arith.constant 0 : index
    %10 = vector.load %arg5[%c0_9, %c0_10] : memref<64x1xf32, #tpu.memory_space<vmem>>, vector<64x1xf32>
    %11 = vector.broadcast %10 : vector<64x1xf32> to vector<64x128xf32>
    %12 = arith.addf %9, %11 : vector<64x128xf32>
    %cst_11 = arith.constant 0.000000e+00 : f32
    %13 = vector.broadcast %cst_11 : f32 to vector<64x128xf32>
    %14 = arith.maximumf %12, %13 : vector<64x128xf32>
    %c0_12 = arith.constant 0 : index
    %c0_13 = arith.constant 0 : index
    %15 = vector.load %arg6[%c0_12, %c0_13] : memref<64x1xf32, #tpu.memory_space<vmem>>, vector<64x1xf32>
    %16 = vector.broadcast %15 : vector<64x1xf32> to vector<64x128xf32>
    %17 = arith.mulf %14, %16 : vector<64x128xf32>
    %cst_14 = arith.constant dense<0.000000e+00> : vector<128xf32>
    %18 = vector.multi_reduction <add>, %17, %cst_14 [0] : vector<64x128xf32> to vector<128xf32>
    %19 = vector.shape_cast %18 : vector<128xf32> to vector<1x128xf32>
    %c0_15 = arith.constant 0 : index
    %c0_16 = arith.constant 0 : index
    %20 = vector.load %arg7[%c0_15, %c0_16] : memref<1x1xf32, #tpu.memory_space<vmem>>, vector<1x1xf32>
    %21 = vector.broadcast %20 : vector<1x1xf32> to vector<1x128xf32>
    %22 = arith.addf %19, %21 : vector<1x128xf32>
    %23 = arith.negf %22 : vector<1x128xf32>
    %24 = math.exp %23 : vector<1x128xf32>
    %cst_17 = arith.constant 1.000000e+00 : f32
    %25 = vector.broadcast %cst_17 : f32 to vector<1x128xf32>
    %26 = arith.addf %25, %24 : vector<1x128xf32>
    %27 = arith.divf %25, %26 : vector<1x128xf32>
    %c0_18 = arith.constant 0 : index
    %c0_19 = arith.constant 0 : index
    %28 = vector.load %arg8[%c0_18, %c0_19] : memref<1x128xf32, #tpu.memory_space<vmem>>, vector<1x128xf32>
    tpu.vector_store %arg8[%c0_18, %c0_19], %27 {strides = array<i32>} : memref<1x128xf32, #tpu.memory_space<vmem>>, vector<1x128xf32>,
    return
  }
  func.func @transform_0(%arg0: i32) -> (i32, i32) {
    %c0_i32 = arith.constant 0 : i32
    %c0_i32_0 = arith.constant 0 : i32
    return %c0_i32, %arg0 : i32, i32
  }
  func.func @transform_1(%arg0: i32) -> (i32, i32) {
    %c0_i32 = arith.constant 0 : i32
    %c0_i32_0 = arith.constant 0 : i32
    %c0_i32_1 = arith.constant 0 : i32
    return %c0_i32, %c0_i32_0 : i32, i32
  }
  func.func @transform_2(%arg0: i32) -> (i32, i32) {
    %c0_i32 = arith.constant 0 : i32
    %c0_i32_0 = arith.constant 0 : i32
    %c0_i32_1 = arith.constant 0 : i32
    return %c0_i32, %c0_i32_0 : i32, i32
  }
  func.func @transform_3(%arg0: i32) -> (i32, i32) {
    %c0_i32 = arith.constant 0 : i32
    %c0_i32_0 = arith.constant 0 : i32
    %c0_i32_1 = arith.constant 0 : i32
    return %c0_i32, %c0_i32_0 : i32, i32
  }
  func.func @transform_4(%arg0: i32) -> (i32, i32) {
    %c0_i32 = arith.constant 0 : i32
    %c0_i32_0 = arith.constant 0 : i32
    %c0_i32_1 = arith.constant 0 : i32
    return %c0_i32, %c0_i32_0 : i32, i32
  }
  func.func @transform_5(%arg0: i32) -> (i32, i32) {
    %c0_i32 = arith.constant 0 : i32
    %c0_i32_0 = arith.constant 0 : i32
    %c0_i32_1 = arith.constant 0 : i32
    return %c0_i32, %c0_i32_0 : i32, i32
  }
  func.func @transform_6(%arg0: i32) -> (i32, i32) {
    %c0_i32 = arith.constant 0 : i32
    %c0_i32_0 = arith.constant 0 : i32
    %c0_i32_1 = arith.constant 0 : i32
    return %c0_i32, %c0_i32_0 : i32, i32
  }
  func.func @transform_7(%arg0: i32) -> (i32, i32) {
    %c0_i32 = arith.constant 0 : i32
    %c0_i32_0 = arith.constant 0 : i32
    return %c0_i32, %arg0 : i32, i32
  }
}

</mosaic_0001>

<bundles_post_ra>
// kernel: tpu_custom_call.1
= control target key start
LH: loop header
LB: loop body
LE: loop exit
PB: predicated region body
PF: predicated region fallthrough
CT: control target
= control target key end

     0   :  { %s857_s0 = inlined_call_operand.vmem [shape: f32[32,128], index: 0, kind: input, shape index: {}]   ;;  %s858_s1 = inlined_call_operand.vmem [shape: f32[64,32], index: 1, kind: input, shape index: {}]   ;;  %s859_s2 = inlined_call_operand.vmem [shape: f32[64,1], index: 2, kind: input, shape index: {}]   ;;  %s860_s3 = inlined_call_operand.vmem [shape: f32[64,64], index: 3, kind: input, shape index: {}]   ;;  %s861_s4 = inlined_call_operand.vmem [shape: f32[64,1], index: 4, kind: input, shape index: {}]   ;;  %s862_s5 = inlined_call_operand.vmem [shape: f32[64,1], index: 5, kind: input, shape index: {}]   ;;  %s863_s6 = inlined_call_operand.<no memory space> [shape: f32[1,1], index: 6, kind: input, shape index: {}]   ;;  %s864_s7 = inlined_call_operand.hbm [shape: f32[1,128], index: 7, kind: output, shape index: {}]  }
   0x1   :  { %v12_v0 = vstv %s863_s6 }
   0x2   :  { %13 = vst [vmem:[#allocation2] sm:$0x1] %v12_v0 }
   0x3   :  { %v40_v1 = vld [vmem:[%s857_s0 + $0x18] sm:$0xff]  ;;  %v39_v2 = vld [vmem:[%s857_s0 + $0x10] sm:$0xff]  ;;  %vm89_vm0 = vcmask 261120   ;;  %v29_v3 = vld [vmem:[%s858_s1] sm:$0xff]  ;;  %v661_v4 = vmov 0  }
   0x4   :  { %567 = vmatprep.subr.mxu0 %v40_v1  ;;  %633 = vset.pattern.permute.xlu0 %v661_v4  ;;  %v38_v5 = vld [vmem:[%s857_s0 + $0x8] sm:$0xff]  ;;  %v37_v6 = vld [vmem:[%s857_s0] sm:$0xff]  ;;  %v48_v7 = vld [vmem:[%s859_s2 + $0x38] sm:$0xff] }
   0x5   :  { %568 = vmatpush3.msra.mxu0 %v40_v1  ;;  %575 = vmatprep.mubr.msk.f32.mxu0 %vm89_vm0, %v29_v3  ;;  %v46_v8 = vld [vmem:[%s859_s2 + $0x28] sm:$0xff]  ;;  %v47_v10 = vld [vmem:[%s859_s2 + $0x30] sm:$0xff]  ;;  %v45_v12 = vld [vmem:[%s859_s2 + $0x20] sm:$0xff] }
   0x6   :  { %569 = vmatprep.subr.mxu0 %v39_v2  ;;  %634 = vset.pattern.permute.xlu1 %v661_v4  ;;  %v30_v9 = vld [vmem:[%s858_s1 + $0x8] sm:$0xff]  ;;  %v31_v11 = vld [vmem:[%s858_s1 + $0x10] sm:$0xff]  ;;  %v32_v13 = vld [vmem:[%s858_s1 + $0x18] sm:$0xff] }
   0x7   :  { %570 = vmatpush3.msra.mxu0 %v39_v2  ;;  %86 = vperm.xlu0 %633, %v48_v7   ;;  %v44_v14 = vld [vmem:[%s859_s2 + $0x18] sm:$0xff]  ;;  %v33_v15 = vld [vmem:[%s858_s1 + $0x20] sm:$0xff]  ;;  %v43_v16 = vld [vmem:[%s859_s2 + $0x10] sm:$0xff] }
   0x8   :  { %571 = vmatprep.subr.mxu0 %v38_v5  ;;  %76 = vperm.xlu1 %634, %v46_v8  }
   0x9   :  { %572 = vmatpush3.msra.mxu0 %v38_v5 }
   0xa   :  { %573 = vmatprep.subr.mxu0 %v37_v6 }
   0xb   :  { %574 = vmatpush3.msra.mxu0 %v37_v6  ;;  %81 = vperm.xlu0 %633, %v47_v10  }
   0xc   :  { %576 = vmatmul.mubr.msk.f32.vlgmr.msra.gmra.mxu0 %vm89_vm0, %v30_v9  ;;  %71 = vperm.xlu1 %634, %v45_v12  }
   0xd   :  { %578 = vmatprep.mubr.msk.f32.mxu0 %vm89_vm0, %v31_v11 }
   0xe   :  { %14 = vsyncpa [#allocation4], 0  ;;  %v34_v17 = vld [vmem:[%s858_s1 + $0x28] sm:$0xff]  ;;  %v35_v19 = vld [vmem:[%s858_s1 + $0x30] sm:$0xff]  ;;  %vm283_vm1 = vcmask 523264  }
   0xf   :  { %66 = vperm.xlu0 %633, %v44_v14   ;;  %v42_v18 = vld [vmem:[%s859_s2 + $0x8] sm:$0xff]  ;;  %v41_v20 = vld [vmem:[%s859_s2] sm:$0xff]  ;;  %v36_v21 = vld [vmem:[%s858_s1 + $0x38] sm:$0xff] }
  0x10   :  { %579 = vmatmul.mubr.msk.f32.gmra.mxu0 %vm89_vm0, %v32_v13  ;;  %61 = vperm.xlu1 %634, %v43_v16   ;;  %v235_v22 = vld [vmem:[%s861_s4] sm:$0xff]  ;;  %v236_v23 = vld [vmem:[%s861_s4 + $0x8] sm:$0xff]  ;;  %v237_v24 = vld [vmem:[%s861_s4 + $0x10] sm:$0xff] }
  0x11   :  { %581 = vmatprep.mubr.msk.f32.mxu0 %vm89_vm0, %v33_v15  ;;  %v238_v25 = vld [vmem:[%s861_s4 + $0x18] sm:$0xff]  ;;  %v421_v26 = vld [vmem:[%s862_s5] sm:$0xff]  ;;  %v422_v27 = vld [vmem:[%s862_s5 + $0x8] sm:$0xff] }
  0x12   :  { %v239_v28 = vld [vmem:[%s861_s4 + $0x20] sm:$0xff]  ;;  %v423_v29 = vld [vmem:[%s862_s5 + $0x10] sm:$0xff]  ;;  %v240_v30 = vld [vmem:[%s861_s4 + $0x28] sm:$0xff] }
  0x13   :  { %56 = vperm.xlu0 %633, %v42_v18   ;;  %v424_v31 = vld [vmem:[%s862_s5 + $0x18] sm:$0xff]  ;;  %v241_v32 = vld [vmem:[%s861_s4 + $0x30] sm:$0xff]  ;;  %v425_v33 = vld [vmem:[%s862_s5 + $0x20] sm:$0xff] }
  0x14   :  { %582 = vmatmul.mubr.msk.f32.gmra.mxu0 %vm89_vm0, %v34_v17  ;;  %51 = vperm.xlu1 %634, %v41_v20   ;;  %v242_v34 = vld [vmem:[%s861_s4 + $0x38] sm:$0xff]  ;;  %v426_v35 = vld [vmem:[%s862_s5 + $0x28] sm:$0xff]  ;;  %v427_v36 = vld [vmem:[%s862_s5 + $0x30] sm:$0xff] }
  0x15   :  { %584 = vmatprep.mubr.msk.f32.mxu0 %vm89_vm0, %v35_v19  ;;  %v428_v37 = vld [vmem:[%s862_s5 + $0x38] sm:$0xff]  ;;  %v490_v38 = vld [vmem:[#allocation2] sm:$0x1]  ;;  %v229_v40 = vld [vmem:[%s860_s3 + $0x10] sm:$0xff] }
  0x16   :  { %v227_v39 = vld [vmem:[%s860_s3] sm:$0xff]  ;;  %606 = vmatprep.mubr.msk.f32.mxu1 %vm283_vm1, %v229_v40  ;;  %v228_v9 = vld [vmem:[%s860_s3 + $0x8] sm:$0xff]  ;;  %v230_v10 = vld [vmem:[%s860_s3 + $0x18] sm:$0xff] }
  0x17   :  { %245 = vperm.xlu0 %633, %v235_v22   ;;  %v231_v11 = vld [vmem:[%s860_s3 + $0x20] sm:$0xff]  ;;  %v232_v12 = vld [vmem:[%s860_s3 + $0x28] sm:$0xff]  ;;  %v233_v13 = vld [vmem:[%s860_s3 + $0x30] sm:$0xff] }
  0x18   :  { %585 = vmatmul.mubr.msk.f32.gmra.mxu0 %vm89_vm0, %v36_v21  ;;  %250 = vperm.xlu1 %634, %v236_v23   ;;  %v234_v14 = vld [vmem:[%s860_s3 + $0x38] sm:$0xff]  ;;  %s662_s3 = smov [#allocation3]  }
  0x19   :  { %603 = vmatprep.mubr.msk.f32.mxu0 %vm283_vm1, %v227_v39  ;;  %s514_s6 = sshll.u32 %s662_s3, 4  ;;  %s515_s6 = int_to_ptr.vmem [resolvable:$true] %s514_s6 }
  0x1a   :  { %s639_s10 = scalar_lea.vmem %s515_s6, 16  ;;  %s643_s11 = scalar_lea.vmem %s515_s6, 32 }
  0x1b   :  { %255 = vperm.xlu0 %633, %v237_v24   ;;  %p640_p0 = scmp.ne.s32.totalorder %s515_s6, %s639_s10  ;;  %p644_p1 = scmp.lt.s32.totalorder %s515_s6, %s515_s6 }
  0x1c   :  { %260 = vperm.xlu1 %634, %v238_v25   ;;  %p645_p2 = scmp.lt.s32.totalorder %s643_s11, %s639_s10 }
  0x1e   :  { %p646_p3 = por %p645_p2, %p644_p1 }
  0x1f   :  { %431 = vperm.xlu0 %633, %v421_v26  }
  0x20   :  { %436 = vperm.xlu1 %634, %v422_v27   ;;  %p647_p4 = pnand %p646_p3, %p640_p0 }
  0x23   :  { %265 = vperm.xlu0 %633, %v239_v28  }
  0x24   :  { %441 = vperm.xlu1 %634, %v423_v29  }
  0x27   :  { %270 = vperm.xlu0 %633, %v240_v30  }
  0x28   :  { %446 = vperm.xlu1 %634, %v424_v31  }
  0x2b   :  { %275 = vperm.xlu0 %633, %v241_v32  }
  0x2c   :  { %451 = vperm.xlu1 %634, %v425_v33  }
  0x2f   :  { %280 = vperm.xlu0 %633, %v242_v34  }
  0x30   :  { %456 = vperm.xlu1 %634, %v426_v35  }
  0x33   :  { %461 = vperm.xlu0 %633, %v427_v36  }
  0x34   :  { %466 = vperm.xlu1 %634, %v428_v37  }
  0x37   :  { %493 = vperm.xlu0 %633, %v490_v38  }
  0x82   :  { %v87_v43 = vpop.permute.xlu0 %86 }
  0x83   :  { %v77_v45 = vpop.permute.xlu1 %76 }
  0x86   :  { %v82_v48 = vpop.permute.xlu0 %81 }
  0x87   :  { %v72_v50 = vpop.permute.xlu1 %71 }
  0x8a   :  { %v67_v57 = vpop.permute.xlu0 %66 }
  0x8b   :  { %v62_v60 = vpop.permute.xlu1 %61 }
  0x8e   :  { %v57_v1 = vpop.permute.xlu0 %56 }
  0x8f   :  { %v52_v4 = vpop.permute.xlu1 %51 }
  0x92   :  { %v246_v15 = vpop.permute.xlu0 %245 }
  0x93   :  { %v251_v16 = vpop.permute.xlu1 %250 }
  0x96   :  { %v256_v17 = vpop.permute.xlu0 %255 }
  0x97   :  { %v261_v18 = vpop.permute.xlu1 %260 }
  0x9a   :  { %v432_v19 = vpop.permute.xlu0 %431 }
  0x9b   :  { %v437_v20 = vpop.permute.xlu1 %436 }
  0x9e   :  { %v266_v21 = vpop.permute.xlu0 %265 }
  0x9f   :  { %v442_v22 = vpop.permute.xlu1 %441 }
  0xa2   :  { %v271_v23 = vpop.permute.xlu0 %270 }
  0xa3   :  { %v447_v24 = vpop.permute.xlu1 %446 }
  0xa6   :  { %v276_v34 = vpop.permute.xlu0 %275 }
  0xa7   :  { %v452_v38 = vpop.permute.xlu1 %451 }
  0xcc   :  { %v577_v41 = vpop.f32.mrf.mxu0 }
  0xcd   :  { %v186_v2 = vadd.f32 %v577_v41, %v57_v1 }
  0xce   :  { %v180_v42 = vpop.f32.mrf.mxu0 }
  0xcf   :  { %v181_v5 = vadd.f32 %v180_v42, %v52_v4  ;;  %v220_v7 = vmax.f32 %v186_v2, 0.0 }
  0xd0   :  { %v580_v44 = vpop.f32.mrf.mxu0 }
  0xd1   :  { %v196_v61 = vadd.f32 %v580_v44, %v67_v57  ;;  %v219_v8 = vmax.f32 %v181_v5, 0.0  ;;  %v496_v5 = vlaneseq }
  0xd2   :  { %v190_v46 = vpop.f32.mrf.mxu0 }
  0xd3   :  { %v191_v63 = vadd.f32 %v190_v46, %v62_v60  ;;  %v222_v3 = vmax.f32 %v196_v61, 0.0 }
  0xd4   :  { %v583_v47 = vpop.f32.mrf.mxu0 }
  0xd5   :  { %v206_v54 = vadd.f32 %v583_v47, %v77_v45  ;;  %v221_v6 = vmax.f32 %v191_v63, 0.0 }
  0xd6   :  { %v200_v49 = vpop.f32.mrf.mxu0 }
  0xd7   :  { %v201_v58 = vadd.f32 %v200_v49, %v72_v50  ;;  %v224_v62 = vmax.f32 %v206_v54, 0.0  ;;  %v281_v49 = vpop.permute.xlu0 %280 }
  0xd8   :  { %v586_v51 = vpop.f32.mrf.mxu0 }
  0xd9   :  { %v216_v52 = vadd.f32 %v586_v51, %v87_v43  ;;  %v223_v0 = vmax.f32 %v201_v58, 0.0 }
  0xda   :  { %v210_v53 = vpop.f32.mrf.mxu0 }
  0xdb   :  { %v226_v55 = vmax.f32 %v216_v52, 0.0  ;;  %v211_v56 = vadd.f32 %v210_v53, %v82_v48  ;;  %v462_v63 = vpop.permute.xlu0 %461 }
  0xdd   :  { %v225_v59 = vmax.f32 %v211_v56, 0.0  ;;  %587 = vmatprep.subr.mxu0 %v226_v55  ;;  %615 = vmatprep.subr.mxu1 %v226_v55  ;;  %v457_v56 = vpop.permute.xlu1 %456 }
  0xde   :  { %588 = vmatpush3.msra.mxu0 %v226_v55  ;;  %623 = vmatpush3.msra.mxu1 %v226_v55 }
  0xdf   :  { %589 = vmatprep.subr.mxu0 %v225_v59  ;;  %616 = vmatprep.subr.mxu1 %v225_v59 }
  0xe0   :  { %590 = vmatpush3.msra.mxu0 %v225_v59  ;;  %624 = vmatpush3.msra.mxu1 %v225_v59 }
  0xe1   :  { %591 = vmatprep.subr.mxu0 %v224_v62  ;;  %617 = vmatprep.subr.mxu1 %v224_v62  ;;  %v467_v2 = vpop.permute.xlu1 %466 }
  0xe2   :  { %592 = vmatpush3.msra.mxu0 %v224_v62  ;;  %625 = vmatpush3.msra.mxu1 %v224_v62 }
  0xe3   :  { %593 = vmatprep.subr.mxu0 %v223_v0  ;;  %618 = vmatprep.subr.mxu1 %v223_v0 }
  0xe4   :  { %594 = vmatpush3.msra.mxu0 %v223_v0  ;;  %626 = vmatpush3.msra.mxu1 %v223_v0 }
  0xe5   :  { %595 = vmatprep.subr.mxu0 %v222_v3  ;;  %619 = vmatprep.subr.mxu1 %v222_v3 }
  0xe6   :  { %596 = vmatpush3.msra.mxu0 %v222_v3  ;;  %627 = vmatpush3.msra.mxu1 %v222_v3 }
  0xe7   :  { %597 = vmatprep.subr.mxu0 %v221_v6  ;;  %620 = vmatprep.subr.mxu1 %v221_v6 }
  0xe8   :  { %598 = vmatpush3.msra.mxu0 %v221_v6  ;;  %628 = vmatpush3.msra.mxu1 %v221_v6 }
  0xe9   :  { %599 = vmatprep.subr.mxu0 %v220_v7  ;;  %621 = vmatprep.subr.mxu1 %v220_v7 }
  0xea   :  { %600 = vmatpush3.msra.mxu0 %v220_v7  ;;  %629 = vmatpush3.msra.mxu1 %v220_v7 }
  0xeb   :  { %601 = vmatprep.subr.mxu0 %v219_v8  ;;  %622 = vmatprep.subr.mxu1 %v219_v8 }
  0xec   :  { %602 = vmatpush3.msra.mxu0 %v219_v8  ;;  %630 = vmatpush3.msra.mxu1 %v219_v8  ;;  %v497_v8 = vshrl.u32 %v496_v5, 7 }
  0xed   :  { %604 = vmatmul.mubr.msk.f32.vlgmr.msra.gmra.mxu0 %vm283_vm1, %v228_v9  ;;  %607 = vmatmul.mubr.msk.f32.vlgmr.msra.gmra.mxu1 %vm283_vm1, %v230_v10 }
  0xee   :  { %609 = vmatprep.mubr.msk.f32.mxu1 %vm283_vm1, %v231_v11  ;;  %v498_v11 = vsub.s32 0, %v497_v8 }
  0xf1   :  { %610 = vmatmul.mubr.msk.f32.gmra.mxu1 %vm283_vm1, %v232_v12 }
  0xf2   :  { %612 = vmatprep.mubr.msk.f32.mxu1 %vm283_vm1, %v233_v13  ;;  %v494_v13 = vpop.permute.xlu0 %493 }
  0xf5   :  { %613 = vmatmul.mubr.msk.f32.gmra.mxu1 %vm283_vm1, %v234_v14 }
 0x1ad   :  { %v605_v25 = vpop.f32.mrf.mxu0  ;;  %v608_v26 = vpop.f32.mrf.mxu1 }
 0x1ae   :  { %v380_v27 = vadd.f32 %v605_v25, %v251_v16  ;;  %v390_v28 = vadd.f32 %v608_v26, %v261_v18 }
 0x1af   :  { %v374_v29 = vpop.f32.mrf.mxu0  ;;  %v384_v30 = vpop.f32.mrf.mxu1 }
 0x1b0   :  { %v414_v31 = vmax.f32 %v380_v27, 0.0  ;;  %v375_v32 = vadd.f32 %v374_v29, %v246_v15  ;;  %v385_v33 = vadd.f32 %v384_v30, %v256_v17  ;;  %v416_v39 = vmax.f32 %v390_v28, 0.0 }
 0x1b1   :  { %v611_v35 = vpop.f32.mrf.mxu1  ;;  %v499_v15 = vrot.slane %v494_v13, %v498_v11 }
 0x1b2   :  { %v413_v36 = vmax.f32 %v375_v32, 0.0  ;;  %v415_v37 = vmax.f32 %v385_v33, 0.0  ;;  %v470_v41 = vmul.f32 %v437_v20, %v414_v31  ;;  %v400_v43 = vadd.f32 %v611_v35, %v271_v23 }
 0x1b3   :  { %v394_v40 = vpop.f32.mrf.mxu1  ;;  %v472_v50 = vmul.f32 %v447_v24, %v416_v39 }
 0x1b4   :  { %v469_v42 = vmul.f32 %v432_v19, %v413_v36  ;;  %v395_v44 = vadd.f32 %v394_v40, %v266_v21  ;;  %v471_v47 = vmul.f32 %v442_v22, %v415_v37  ;;  %v418_v53 = vmax.f32 %v400_v43, 0.0 }
 0x1b5   :  { %v614_v45 = vpop.f32.mrf.mxu1 }
 0x1b6   :  { %v477_v46 = vadd.f32 %v470_v41, %v469_v42  ;;  %v417_v48 = vmax.f32 %v395_v44, 0.0  ;;  %v410_v54 = vadd.f32 %v614_v45, %v281_v49  ;;  %v474_v60 = vmul.f32 %v457_v56, %v418_v53 }
 0x1b7   :  { %v404_v51 = vpop.f32.mrf.mxu1 }
 0x1b8   :  { %v478_v52 = vadd.f32 %v477_v46, %v471_v47  ;;  %v405_v55 = vadd.f32 %v404_v51, %v276_v34  ;;  %v473_v57 = vmul.f32 %v452_v38, %v417_v48  ;;  %v420_v62 = vmax.f32 %v410_v54, 0.0 }
 0x1ba   :  { %v479_v58 = vadd.f32 %v478_v52, %v472_v50  ;;  %v419_v59 = vmax.f32 %v405_v55, 0.0  ;;  %v476_v3 = vmul.f32 %v467_v2, %v420_v62 }
 0x1bc   :  { %v480_v61 = vadd.f32 %v479_v58, %v473_v57  ;;  %v475_v0 = vmul.f32 %v462_v63, %v419_v59 }
 0x1be   :  { %v481_v1 = vadd.f32 %v480_v61, %v474_v60 }
 0x1c0   :  { %v482_v4 = vadd.f32 %v481_v1, %v475_v0 }
 0x1c2   :  { %v483_v6 = vadd.f32 %v482_v4, %v476_v3 }
 0x1c4   :  { %v484_v7 = vrot.slane %v483_v6, 4 }
 0x1c6   :  { %v485_v9 = vadd.f32 %v484_v7, %v483_v6 }
 0x1c8   :  { %v486_v10 = vrot.slane %v485_v9, 2 }
 0x1ca   :  { %v487_v12 = vadd.f32 %v486_v10, %v485_v9 }
 0x1cc   :  { %v488_v14 = vrot.slane %v487_v12, 1 }
 0x1ce   :  { %v489_v16 = vadd.f32 %v488_v14, %v487_v12 }
 0x1d0   :  { %v500_v17 = vadd.f32 %v499_v15, %v489_v16 }
 0x1d2   :  { %v538_v18 = vmul.f32 -1.442695, %v500_v17 }
 0x1d4   :  { %635 = vpow2.f32 %v538_v18 }
 0x1e1   :  { %v636_v19 = vpop.eup %635 }
 0x1e2   :  { %v504_v20 = vadd.f32 1.0, %v636_v19 }
 0x1e4   :  { %637 = vrcp.f32 %v504_v20 }
 0x1f1   :  { %v638_v21 = vpop.eup %637 }
 0x1f2   :  { %507 = vst [vmem:[#allocation3] sm:$0x1] %v638_v21 }
 0x1f3   :  { %650 = shalt.err (!%p647_p4)
}
 0x1f4   :  { %517 = dma.vmem_to_hbm [thread:$0]  %s515_s6, 16, %s864_s7, [#allocation4]  }
 0x1f5   :  { %659 = dma.done.wait [#allocation4], 16  }
 0x1f6   :  { %660 = vsyncadd [#allocation4], 4294967280 }
 0x1f7   :  { %521 = vsyncpa [#allocation4], 1 }

</bundles_post_ra>
